<compile_context>
chip_gen: v6e
topology: v6e:2x2x1
jax: 0.10.0
libtpu: 0.0.40
codegen_flags: <defaults>
</compile_context>

<pallas_src>
import functools

import jax
import jax.numpy as jnp
from jax.experimental import pallas as pl
from jax.experimental.pallas import tpu as pltpu

BN_EPS = 1e-5
_LANE = 128          # TPU vreg lane width
_ALIGN_ROWS = 8      # band-matmul operands start on an 8-row (sublane) boundary
_TARGET_M = 256      # target matmul M per grid step (= images_per_step * H/R)


# --------------------------- fused kernel body ---------------------------
def _make_basic_block_kernel(hp):
    """Fused BasicBlock kernel; `hp` = folded rows per image (static int)."""

    def kernel(x_ref, w1_ref, b1_ref, w2_ref, b2_ref, o_ref, xpad_ref, hpad_ref):
        # x_ref/o_ref : (M, L)        M = B*hp stacked folded rows, L = R*W*C lanes
        # w*_ref      : (3, L, L)     band weights (taps -1/0/+1 over folded rows,
        #                             BN scale folded in)
        # b*_ref      : (1, L)        BN bias tiled across (R, W)
        # xpad/hpad   : (P+M+1, L)    VMEM staging for x / intermediate h
        M, L = x_ref.shape
        mxu_dtype = xpad_ref.dtype
        P = _ALIGN_ROWS

        # Rows P-1 and P+M are only consumed by *masked* band taps; zero them so
        # those matmul rows are finite (mask-multiply then makes them exactly 0).
        z = jnp.zeros((1, L), mxu_dtype)
        xpad_ref[pl.ds(P - 1, 1), :] = z
        xpad_ref[pl.ds(P + M, 1), :] = z
        hpad_ref[pl.ds(P - 1, 1), :] = z
        hpad_ref[pl.ds(P + M, 1), :] = z

        x = x_ref[...]                                   # (M, L), input dtype
        xpad_ref[pl.ds(P, M), :] = x.astype(mxu_dtype)   # aligned store

        # Per-image boundary masks in folded-row units (shared by both convs):
        # the tap reading the folded row ABOVE is invalid at each image's first
        # folded row; the tap reading the row BELOW is invalid at its last one.
        row = jax.lax.broadcasted_iota(jnp.int32, (M, 1), 0)
        i_in_img = row % hp
        m_top = (i_in_img != 0).astype(jnp.float32)          # (M, 1)
        m_bot = (i_in_img != hp - 1).astype(jnp.float32)     # (M, 1)

        def banded_conv(pad_ref, w_ref, b_ref):
            # Tap 1 reads each output row's own folded row (never masked) and
            # initializes the accumulator; taps 0 / 2 read the rows above/below.
            acc = jnp.dot(pad_ref[pl.ds(P, M), :], w_ref[1],
                          preferred_element_type=jnp.float32)
            acc = acc + m_top * jnp.dot(pad_ref[pl.ds(P - 1, M), :], w_ref[0],
                                        preferred_element_type=jnp.float32)
            acc = acc + m_bot * jnp.dot(pad_ref[pl.ds(P + 1, M), :], w_ref[2],
                                        preferred_element_type=jnp.float32)
            return acc + b_ref[...]                      # folded-BN bias

        # conv1 + BN1 + ReLU.  Dropout2d is identity in eval mode.
        # TODO(synk): training-mode Dropout2d (per-(N,C) channel zeroing with
        # 1/(1-p) scaling) and BN batch statistics are not implemented.
        h = jnp.maximum(banded_conv(xpad_ref, w1_ref, b1_ref), 0.0)
        hpad_ref[pl.ds(P, M), :] = h.astype(mxu_dtype)   # h never touches HBM

        # conv2 + BN2 + residual + ReLU (residual = raw input; no downsample).
        out = banded_conv(hpad_ref, w2_ref, b2_ref) + x.astype(jnp.float32)
        o_ref[...] = jnp.maximum(out, 0.0).astype(o_ref.dtype)

    return kernel


# --------------------------- weight preparation ---------------------------
def _fold_bn(gamma, beta, mean, var):
    scale = (gamma / jnp.sqrt(var + BN_EPS)).astype(jnp.float32)
    bias = (beta - mean * scale).astype(jnp.float32)
    return scale, bias


def _banded_conv_weights(w_oihw, scale, W):
    """(Cout, Cin, 3, 3) conv weight (+folded BN scale) -> (3, W*Cin, W*Cout).

    Band dy maps one input image row (flattened (W, Cin) on lanes) to one output
    row; the x-direction 'SAME' zero padding is folded into the band structure.
    Built once at trace time on tiny weights.
    """
    Cout, Cin, _, _ = w_oihw.shape
    w = jnp.transpose(w_oihw, (2, 3, 1, 0)).astype(jnp.float32)   # (ky, kx, Cin, Cout)
    w = w * scale[None, None, None, :]                            # fold BN scale
    bands = []
    for dy in range(3):
        band = jnp.zeros((W * Cin, W * Cout), jnp.float32)
        for dx in range(3):
            # sel[x_in, x_out] = 1  iff  x_in == x_out + dx - 1
            sel = jnp.eye(W, W, k=1 - dx, dtype=jnp.float32)
            blk = sel[:, None, :, None] * w[dy, dx][None, :, None, :]
            band = band + blk.reshape(W * Cin, W * Cout)
        bands.append(band)
    return jnp.stack(bands)                                       # (3, W*Cin, W*Cout)


def _fold_rows_into_bands(wband, R):
    """Fold R consecutive image rows onto the lane axis.

    (3, WCi, WCo) per-row band weights -> (3, R*WCi, R*WCo) folded-row band
    weights indexed by tap t+1, t in {-1, 0, +1}: block (a, b) of tap t is the
    original dy = a - b + 1 + t*R band (zero if dy is outside [0, 2]).
    """
    if R == 1:
        return wband
    _, WCi, WCo = wband.shape
    taps = []
    for t in (-1, 0, 1):
        m = jnp.zeros((R * WCi, R * WCo), wband.dtype)
        for a in range(R):            # sub-row within the input folded row
            for b in range(R):        # sub-row within the output folded row
                dy = a - b + 1 + t * R
                if 0 <= dy <= 2:
                    m = m.at[a * WCi:(a + 1) * WCi, b * WCo:(b + 1) * WCo].set(wband[dy])
        taps.append(m)
    return jnp.stack(taps)


def _choose_tiling(N, H, WC):
    """Pick the row-fold factor R and images-per-step B."""
    # Row fold: make the lane dim a multiple of 128 when W*C divides 128 evenly
    # (this is a free reshape of the contiguous NHWC buffer, no data movement).
    R = 1
    if WC < _LANE and _LANE % WC == 0 and H % (_LANE // WC) == 0:
        R = _LANE // WC
    hp = H // R
    # Images per grid step: target M ~ _TARGET_M stacked rows, but keep the grid
    # length >= 2 when the batch allows (v7x has two TensorCores); B must divide N.
    B = max(1, min(N, max(1, _TARGET_M // hp)))
    while B > 1 and (N // B) < 2:
        B -= 1
    while N % B != 0:
        B -= 1
    return R, hp, B


# ------------------------------- entry points -------------------------------
def basic_block_forward_rows(x_rows, params, *, mxu_dtype=jnp.bfloat16):
    """Fused BasicBlock forward on NHWC-rows activations.

    x_rows: (N, H, W*C) with channels fastest (NHWC flattened over (W, C)).
    This is the production entry point: no layout transposes touch HBM, and the
    output is returned in the same layout and dtype (pass bf16 activations to
    halve HBM traffic; compute/epilogue stay in f32).
    """
    N, H, WC = x_rows.shape
    Cout, Cin, _, _ = params["conv1_w"].shape
    assert Cin == Cout, "stride=1 / downsample=None implies inplanes == planes"
    assert WC % Cin == 0
    W = WC // Cin

    R, hp, B = _choose_tiling(N, H, WC)
    lane = R * WC
    M = B * hp                          # matmul M / stacked rows per grid step
    grid = N // B

    s1, b1 = _fold_bn(params["bn1_g"], params["bn1_b"], params["bn1_m"], params["bn1_v"])
    s2, b2 = _fold_bn(params["bn2_g"], params["bn2_b"], params["bn2_m"], params["bn2_v"])
    w1p = _fold_rows_into_bands(_banded_conv_weights(params["conv1_w"], s1, W), R)
    w2p = _fold_rows_into_bands(_banded_conv_weights(params["conv2_w"], s2, W), R)
    w1p = w1p.astype(mxu_dtype)
    w2p = w2p.astype(mxu_dtype)
    b1r = jnp.tile(b1, R * W).reshape(1, lane)      # per-channel bias tiled over (R, W)
    b2r = jnp.tile(b2, R * W).reshape(1, lane)

    # Free reshape: merges contiguous trailing dims of the NHWC buffer so R rows
    # sit side by side on the 128-lane axis and the batch stacks along sublanes.
    x2d = x_rows.reshape(N * hp, lane)

    out2d = pl.pallas_call(
        _make_basic_block_kernel(hp),
        out_shape=jax.ShapeDtypeStruct((N * hp, lane), x_rows.dtype),
        grid_spec=pltpu.PrefetchScalarGridSpec(
            num_scalar_prefetch=0,
            grid=(grid,),                                         # B images per step
            in_specs=[
                pl.BlockSpec((M, lane), lambda g: (g, 0)),            # x (residual too)
                pl.BlockSpec((3, lane, lane), lambda g: (0, 0, 0)),   # conv1 bands (resident)
                pl.BlockSpec((1, lane), lambda g: (0, 0)),            # bn1 bias
                pl.BlockSpec((3, lane, lane), lambda g: (0, 0, 0)),   # conv2 bands (resident)
                pl.BlockSpec((1, lane), lambda g: (0, 0)),            # bn2 bias
            ],
            out_specs=pl.BlockSpec((M, lane), lambda g: (g, 0)),
            scratch_shapes=[
                pltpu.VMEM((_ALIGN_ROWS + M + 1, lane), mxu_dtype),   # staged x + band rows
                pltpu.VMEM((_ALIGN_ROWS + M + 1, lane), mxu_dtype),   # intermediate h
            ],
        ),
        compiler_params=pltpu.CompilerParams(
            dimension_semantics=("parallel",),    # batch groups split across TCs on v7x
        ),
    )(x2d, w1p, b1r, w2p, b2r)

    return out2d.reshape(N, H, WC)


def basic_block_forward_nchw(x_nchw, params, *, mxu_dtype=jnp.bfloat16):
    """Compatibility shim for PyTorch-layout NCHW tensors.

    The two transposes here are full HBM round trips; production callers should
    keep activations in NHWC-rows end-to-end and call basic_block_forward_rows.
    """
    N, C, H, W = x_nchw.shape
    x_rows = jnp.transpose(x_nchw, (0, 2, 3, 1)).reshape(N, H, W * C)
    out = basic_block_forward_rows(x_rows, params, mxu_dtype=mxu_dtype)
    return jnp.transpose(out.reshape(N, H, W, C), (0, 3, 1, 2))


# ---------------- pure-JAX reference (sanity check) ----------------
def _ref_forward(x_nchw, params):
    x = jnp.transpose(x_nchw, (0, 2, 3, 1)).astype(jnp.float32)   # NHWC

    def conv(x_nhwc, w_oihw):
        w_hwio = jnp.transpose(w_oihw, (2, 3, 1, 0)).astype(jnp.float32)
        return jax.lax.conv_general_dilated(
            x_nhwc, w_hwio, window_strides=(1, 1), padding="SAME",
            dimension_numbers=("NHWC", "HWIO", "NHWC"))

    def bn(y, g, b, m, v):
        return (y - m) / jnp.sqrt(v + BN_EPS) * g + b

    h = jax.nn.relu(bn(conv(x, params["conv1_w"]),
                       params["bn1_g"], params["bn1_b"], params["bn1_m"], params["bn1_v"]))
    o = bn(conv(h, params["conv2_w"]),
           params["bn2_g"], params["bn2_b"], params["bn2_m"], params["bn2_v"])
    o = jax.nn.relu(o + x)
    return jnp.transpose(o, (0, 3, 1, 2))


def _make_params(key, C):
    ks = jax.random.split(key, 10)
    return {
        "conv1_w": jax.random.normal(ks[0], (C, C, 3, 3), jnp.float32) * 0.2,
        "conv2_w": jax.random.normal(ks[1], (C, C, 3, 3), jnp.float32) * 0.2,
        "bn1_g": 1.0 + 0.1 * jax.random.normal(ks[2], (C,), jnp.float32),
        "bn1_b": 0.1 * jax.random.normal(ks[3], (C,), jnp.float32),
        "bn1_m": 0.1 * jax.random.normal(ks[4], (C,), jnp.float32),
        "bn1_v": 0.5 + jax.random.uniform(ks[5], (C,), jnp.float32),
        "bn2_g": 1.0 + 0.1 * jax.random.normal(ks[6], (C,), jnp.float32),
        "bn2_b": 0.1 * jax.random.normal(ks[7], (C,), jnp.float32),
        "bn2_m": 0.1 * jax.random.normal(ks[8], (C,), jnp.float32),
        "bn2_v": 0.5 + jax.random.uniform(ks[9], (C,), jnp.float32),
    }


def _check(N, C, H, W, key, mxu_dtype, tol):
    kx, kp = jax.random.split(key)
    x = jax.random.normal(kx, (N, C, H, W), jnp.float32)
    params = _make_params(kp, C)
    ref = jax.block_until_ready(_ref_forward(x, params))
    fn = jax.jit(functools.partial(basic_block_forward_nchw, mxu_dtype=mxu_dtype))
    out = jax.block_until_ready(fn(x, params))
    assert out.shape == (N, C, H, W), out.shape
    err = float(jnp.max(jnp.abs(out - ref)))
    assert err < tol, f"mismatch N={N} C={C} H={H} W={W} {mxu_dtype}: max_err={err} tol={tol}"
    return err


if __name__ == "__main__":
    key = jax.random.PRNGKey(0)
    k1, k2, k3, k4 = jax.random.split(key, 4)

    # Primary module-consistent shape: batch=2, channels=4, spatial=16.
    # W*C = 64 -> R = 2 row fold (128 lanes), B = 1 image/step, grid = 2.
    _check(2, 4, 16, 16, k1, jnp.float32, 2e-2)      # f32 MXU operands: tight check
    _check(2, 4, 16, 16, k2, jnp.bfloat16, 2e-1)     # default bf16 MXU operands

    # Exercise per-step image batching (B = 4, M = 32) + inter-image band masks.
    _check(8, 4, 16, 16, k3, jnp.float32, 2e-2)

    # Exercise the unfolded path (W*C = 128 is already lane-dense, R = 1).
    _check(4, 8, 16, 16, k4, jnp.float32, 2e-2)

    print("KERNEL_OK")
</pallas_src>

<mosaic_0001>
module attributes {stable_mosaic.version = 11 : i64} {
  func.func @kernel(%arg0: i32, %arg1: memref<8x128xf32, #tpu.memory_space<vmem>>, %arg2: memref<3x128x128xf32, #tpu.memory_space<vmem>>, %arg3: memref<1x128xf32, #tpu.memory_space<vmem>>, %arg4: memref<3x128x128xf32, #tpu.memory_space<vmem>>, %arg5: memref<1x128xf32, #tpu.memory_space<vmem>>, %arg6: memref<8x128xf32, #tpu.memory_space<vmem>>, %arg7: memref<17x128xf32, #tpu.memory_space<vmem>>, %arg8: memref<17x128xf32, #tpu.memory_space<vmem>>) attributes {dimension_semantics = [#tpu.dimension_semantics<parallel>], iteration_bounds = array<i64: 2>, scalar_prefetch = 0 : i64, scratch_operands = 2 : i64, tpu.core_type = #tpu.core_type<tc>, window_params = [{transform_indices = @transform_0, window_bounds = array<i64: 8, 128>}, {pipeline_mode = #tpu.pipeline_mode<synchronous>, transform_indices = @transform_1, window_bounds = array<i64: 3, 128, 128>}, {pipeline_mode = #tpu.pipeline_mode<synchronous>, transform_indices = @transform_2, window_bounds = array<i64: 1, 128>}, {pipeline_mode = #tpu.pipeline_mode<synchronous>, transform_indices = @transform_3, window_bounds = array<i64: 3, 128, 128>}, {pipeline_mode = #tpu.pipeline_mode<synchronous>, transform_indices = @transform_4, window_bounds = array<i64: 1, 128>}, {transform_indices = @transform_5, window_bounds = array<i64: 8, 128>}]} {
    %cst = arith.constant 0.000000e+00 : f32
    %0 = vector.broadcast %cst : f32 to vector<1x128xf32>
    %c7 = arith.constant 7 : index
    %c0 = arith.constant 0 : index
    %1 = vector.load %arg7[%c7, %c0] : memref<17x128xf32, #tpu.memory_space<vmem>>, vector<1x128xf32>
    tpu.vector_store %arg7[%c7, %c0], %0 {strides = array<i32>} : memref<17x128xf32, #tpu.memory_space<vmem>>, vector<1x128xf32>,
    %c16 = arith.constant 16 : index
    %c0_0 = arith.constant 0 : index
    %2 = vector.load %arg7[%c16, %c0_0] : memref<17x128xf32, #tpu.memory_space<vmem>>, vector<1x128xf32>
    tpu.vector_store %arg7[%c16, %c0_0], %0 {strides = array<i32>} : memref<17x128xf32, #tpu.memory_space<vmem>>, vector<1x128xf32>,
    %c7_1 = arith.constant 7 : index
    %c0_2 = arith.constant 0 : index
    %3 = vector.load %arg8[%c7_1, %c0_2] : memref<17x128xf32, #tpu.memory_space<vmem>>, vector<1x128xf32>
    tpu.vector_store %arg8[%c7_1, %c0_2], %0 {strides = array<i32>} : memref<17x128xf32, #tpu.memory_space<vmem>>, vector<1x128xf32>,
    %c16_3 = arith.constant 16 : index
    %c0_4 = arith.constant 0 : index
    %4 = vector.load %arg8[%c16_3, %c0_4] : memref<17x128xf32, #tpu.memory_space<vmem>>, vector<1x128xf32>
    tpu.vector_store %arg8[%c16_3, %c0_4], %0 {strides = array<i32>} : memref<17x128xf32, #tpu.memory_space<vmem>>, vector<1x128xf32>,
    %c0_5 = arith.constant 0 : index
    %c0_6 = arith.constant 0 : index
    %5 = vector.load %arg1[%c0_5, %c0_6] : memref<8x128xf32, #tpu.memory_space<vmem>>, vector<8x128xf32>
    %c8 = arith.constant 8 : index
    %c0_7 = arith.constant 0 : index
    %6 = vector.load %arg7[%c8, %c0_7] : memref<17x128xf32, #tpu.memory_space<vmem>>, vector<8x128xf32>
    tpu.vector_store %arg7[%c8, %c0_7], %5 {strides = array<i32>} : memref<17x128xf32, #tpu.memory_space<vmem>>, vector<8x128xf32>,
    %7 = tpu.iota {dimensions = array<i32: 0>} : vector<8x1xi32>
    %c8_i32 = arith.constant 8 : i32
    %c0_i32 = arith.constant 0 : i32
    %8 = arith.cmpi eq, %c8_i32, %c0_i32 : i32
    %c1_i32 = arith.constant 1 : i32
    %9 = arith.select %8, %c1_i32, %c8_i32 : i32
    %10 = vector.broadcast %9 : i32 to vector<8x1xi32>
    %11 = arith.remsi %7, %10 : vector<8x1xi32>
    %c0_i32_8 = arith.constant 0 : i32
    %12 = vector.broadcast %c0_i32_8 : i32 to vector<8x1xi32>
    %13 = arith.cmpi ne, %11, %12 : vector<8x1xi32>
    %c0_i32_9 = arith.constant 0 : i32
    %14 = vector.broadcast %c0_i32_9 : i32 to vector<8x1xi32>
    %15 = arith.cmpi slt, %11, %14 : vector<8x1xi32>
    %c0_i32_10 = arith.constant 0 : i32
    %16 = arith.cmpi slt, %9, %c0_i32_10 : i32
    %17 = vector.broadcast %16 : i1 to vector<8x1xi1>
    %18 = vector.broadcast %17 : vector<8x1xi1> to vector<8x1xi1>
    %19 = arith.xori %15, %18 : vector<8x1xi1>
    %20 = arith.andi %19, %13 : vector<8x1xi1>
    %21 = vector.broadcast %9 : i32 to vector<8x1xi32>
    %22 = arith.addi %11, %21 : vector<8x1xi32>
    %23 = arith.select %20, %22, %11 : vector<8x1xi1>, vector<8x1xi32>
    %c0_i32_11 = arith.constant 0 : i32
    %24 = vector.broadcast %c0_i32_11 : i32 to vector<8x1xi32>
    %25 = arith.cmpi ne, %23, %24 : vector<8x1xi32>
    %26 = arith.extui %25 : vector<8x1xi1> to vector<8x1xi32>
    %27 = arith.sitofp %26 : vector<8x1xi32> to vector<8x1xf32>
    %c7_i32 = arith.constant 7 : i32
    %28 = vector.broadcast %c7_i32 : i32 to vector<8x1xi32>
    %29 = arith.cmpi ne, %23, %28 : vector<8x1xi32>
    %30 = arith.extui %29 : vector<8x1xi1> to vector<8x1xi32>
    %31 = arith.sitofp %30 : vector<8x1xi32> to vector<8x1xf32>
    %c8_12 = arith.constant 8 : index
    %c0_13 = arith.constant 0 : index
    %32 = vector.load %arg7[%c8_12, %c0_13] : memref<17x128xf32, #tpu.memory_space<vmem>>, vector<8x128xf32>
    %c1 = arith.constant 1 : index
    %c0_14 = arith.constant 0 : index
    %c0_15 = arith.constant 0 : index
    %33 = vector.load %arg2[%c1, %c0_14, %c0_15] : memref<3x128x128xf32, #tpu.memory_space<vmem>>, vector<1x128x128xf32>
    %34 = vector.shape_cast %33 : vector<1x128x128xf32> to vector<128x128xf32>
    %cst_16 = arith.constant dense<0.000000e+00> : vector<8x128xf32>
    %35 = tpu.matmul %32, %34, %cst_16 {dimension_numbers = #tpu.dot_dimension_numbers<[1], [0], [0], [1], [0, 0, 1, 1], [], []>} : vector<8x128xf32>, vector<128x128xf32>, vector<8x128xf32> -> vector<8x128xf32>
    %c7_17 = arith.constant 7 : index
    %c0_18 = arith.constant 0 : index
    %36 = vector.load %arg7[%c7_17, %c0_18] : memref<17x128xf32, #tpu.memory_space<vmem>>, vector<8x128xf32>
    %c0_19 = arith.constant 0 : index
    %c0_20 = arith.constant 0 : index
    %c0_21 = arith.constant 0 : index
    %37 = vector.load %arg2[%c0_19, %c0_20, %c0_21] : memref<3x128x128xf32, #tpu.memory_space<vmem>>, vector<1x128x128xf32>
    %38 = vector.shape_cast %37 : vector<1x128x128xf32> to vector<128x128xf32>
    %cst_22 = arith.constant dense<0.000000e+00> : vector<8x128xf32>
    %39 = tpu.matmul %36, %38, %cst_22 {dimension_numbers = #tpu.dot_dimension_numbers<[1], [0], [0], [1], [0, 0, 1, 1], [], []>} : vector<8x128xf32>, vector<128x128xf32>, vector<8x128xf32> -> vector<8x128xf32>
    %40 = vector.broadcast %27 : vector<8x1xf32> to vector<8x128xf32>
    %41 = arith.mulf %40, %39 : vector<8x128xf32>
    %42 = arith.addf %35, %41 : vector<8x128xf32>
    %c9 = arith.constant 9 : index
    %c0_23 = arith.constant 0 : index
    %43 = vector.load %arg7[%c9, %c0_23] : memref<17x128xf32, #tpu.memory_space<vmem>>, vector<8x128xf32>
    %c2 = arith.constant 2 : index
    %c0_24 = arith.constant 0 : index
    %c0_25 = arith.constant 0 : index
    %44 = vector.load %arg2[%c2, %c0_24, %c0_25] : memref<3x128x128xf32, #tpu.memory_space<vmem>>, vector<1x128x128xf32>
    %45 = vector.shape_cast %44 : vector<1x128x128xf32> to vector<128x128xf32>
    %cst_26 = arith.constant dense<0.000000e+00> : vector<8x128xf32>
    %46 = tpu.matmul %43, %45, %cst_26 {dimension_numbers = #tpu.dot_dimension_numbers<[1], [0], [0], [1], [0, 0, 1, 1], [], []>} : vector<8x128xf32>, vector<128x128xf32>, vector<8x128xf32> -> vector<8x128xf32>
    %47 = vector.broadcast %31 : vector<8x1xf32> to vector<8x128xf32>
    %48 = arith.mulf %47, %46 : vector<8x128xf32>
    %49 = arith.addf %42, %48 : vector<8x128xf32>
    %c0_27 = arith.constant 0 : index
    %c0_28 = arith.constant 0 : index
    %50 = vector.load %arg3[%c0_27, %c0_28] : memref<1x128xf32, #tpu.memory_space<vmem>>, vector<1x128xf32>
    %51 = vector.broadcast %50 : vector<1x128xf32> to vector<8x128xf32>
    %52 = arith.addf %49, %51 : vector<8x128xf32>
    %cst_29 = arith.constant 0.000000e+00 : f32
    %53 = vector.broadcast %cst_29 : f32 to vector<8x128xf32>
    %54 = arith.maximumf %52, %53 : vector<8x128xf32>
    %c8_30 = arith.constant 8 : index
    %c0_31 = arith.constant 0 : index
    %55 = vector.load %arg8[%c8_30, %c0_31] : memref<17x128xf32, #tpu.memory_space<vmem>>, vector<8x128xf32>
    tpu.vector_store %arg8[%c8_30, %c0_31], %54 {strides = array<i32>} : memref<17x128xf32, #tpu.memory_space<vmem>>, vector<8x128xf32>,
    %c8_32 = arith.constant 8 : index
    %c0_33 = arith.constant 0 : index
    %56 = vector.load %arg8[%c8_32, %c0_33] : memref<17x128xf32, #tpu.memory_space<vmem>>, vector<8x128xf32>
    %c1_34 = arith.constant 1 : index
    %c0_35 = arith.constant 0 : index
    %c0_36 = arith.constant 0 : index
    %57 = vector.load %arg4[%c1_34, %c0_35, %c0_36] : memref<3x128x128xf32, #tpu.memory_space<vmem>>, vector<1x128x128xf32>
    %58 = vector.shape_cast %57 : vector<1x128x128xf32> to vector<128x128xf32>
    %cst_37 = arith.constant dense<0.000000e+00> : vector<8x128xf32>
    %59 = tpu.matmul %56, %58, %cst_37 {dimension_numbers = #tpu.dot_dimension_numbers<[1], [0], [0], [1], [0, 0, 1, 1], [], []>} : vector<8x128xf32>, vector<128x128xf32>, vector<8x128xf32> -> vector<8x128xf32>
    %c7_38 = arith.constant 7 : index
    %c0_39 = arith.constant 0 : index
    %60 = vector.load %arg8[%c7_38, %c0_39] : memref<17x128xf32, #tpu.memory_space<vmem>>, vector<8x128xf32>
    %c0_40 = arith.constant 0 : index
    %c0_41 = arith.constant 0 : index
    %c0_42 = arith.constant 0 : index
    %61 = vector.load %arg4[%c0_40, %c0_41, %c0_42] : memref<3x128x128xf32, #tpu.memory_space<vmem>>, vector<1x128x128xf32>
    %62 = vector.shape_cast %61 : vector<1x128x128xf32> to vector<128x128xf32>
    %cst_43 = arith.constant dense<0.000000e+00> : vector<8x128xf32>
    %63 = tpu.matmul %60, %62, %cst_43 {dimension_numbers = #tpu.dot_dimension_numbers<[1], [0], [0], [1], [0, 0, 1, 1], [], []>} : vector<8x128xf32>, vector<128x128xf32>, vector<8x128xf32> -> vector<8x128xf32>
    %64 = vector.broadcast %27 : vector<8x1xf32> to vector<8x128xf32>
    %65 = arith.mulf %64, %63 : vector<8x128xf32>
    %66 = arith.addf %59, %65 : vector<8x128xf32>
    %c9_44 = arith.constant 9 : index
    %c0_45 = arith.constant 0 : index
    %67 = vector.load %arg8[%c9_44, %c0_45] : memref<17x128xf32, #tpu.memory_space<vmem>>, vector<8x128xf32>
    %c2_46 = arith.constant 2 : index
    %c0_47 = arith.constant 0 : index
    %c0_48 = arith.constant 0 : index
    %68 = vector.load %arg4[%c2_46, %c0_47, %c0_48] : memref<3x128x128xf32, #tpu.memory_space<vmem>>, vector<1x128x128xf32>
    %69 = vector.shape_cast %68 : vector<1x128x128xf32> to vector<128x128xf32>
    %cst_49 = arith.constant dense<0.000000e+00> : vector<8x128xf32>
    %70 = tpu.matmul %67, %69, %cst_49 {dimension_numbers = #tpu.dot_dimension_numbers<[1], [0], [0], [1], [0, 0, 1, 1], [], []>} : vector<8x128xf32>, vector<128x128xf32>, vector<8x128xf32> -> vector<8x128xf32>
    %71 = vector.broadcast %31 : vector<8x1xf32> to vector<8x128xf32>
    %72 = arith.mulf %71, %70 : vector<8x128xf32>
    %73 = arith.addf %66, %72 : vector<8x128xf32>
    %c0_50 = arith.constant 0 : index
    %c0_51 = arith.constant 0 : index
    %74 = vector.load %arg5[%c0_50, %c0_51] : memref<1x128xf32, #tpu.memory_space<vmem>>, vector<1x128xf32>
    %75 = vector.broadcast %74 : vector<1x128xf32> to vector<8x128xf32>
    %76 = arith.addf %73, %75 : vector<8x128xf32>
    %77 = arith.addf %76, %5 : vector<8x128xf32>
    %cst_52 = arith.constant 0.000000e+00 : f32
    %78 = vector.broadcast %cst_52 : f32 to vector<8x128xf32>
    %79 = arith.maximumf %77, %78 : vector<8x128xf32>
    %c0_53 = arith.constant 0 : index
    %c0_54 = arith.constant 0 : index
    %80 = vector.load %arg6[%c0_53, %c0_54] : memref<8x128xf32, #tpu.memory_space<vmem>>, vector<8x128xf32>
    tpu.vector_store %arg6[%c0_53, %c0_54], %79 {strides = array<i32>} : memref<8x128xf32, #tpu.memory_space<vmem>>, vector<8x128xf32>,
    return
  }
  func.func @transform_0(%arg0: i32) -> (i32, i32) {
    %c0_i32 = arith.constant 0 : i32
    %c0_i32_0 = arith.constant 0 : i32
    return %arg0, %c0_i32 : i32, i32
  }
  func.func @transform_1(%arg0: i32) -> (i32, i32, i32) {
    %c0_i32 = arith.constant 0 : i32
    %c0_i32_0 = arith.constant 0 : i32
    %c0_i32_1 = arith.constant 0 : i32
    %c0_i32_2 = arith.constant 0 : i32
    return %c0_i32, %c0_i32_0, %c0_i32_1 : i32, i32, i32
  }
  func.func @transform_2(%arg0: i32) -> (i32, i32) {
    %c0_i32 = arith.constant 0 : i32
    %c0_i32_0 = arith.constant 0 : i32
    %c0_i32_1 = arith.constant 0 : i32
    return %c0_i32, %c0_i32_0 : i32, i32
  }
  func.func @transform_3(%arg0: i32) -> (i32, i32, i32) {
    %c0_i32 = arith.constant 0 : i32
    %c0_i32_0 = arith.constant 0 : i32
    %c0_i32_1 = arith.constant 0 : i32
    %c0_i32_2 = arith.constant 0 : i32
    return %c0_i32, %c0_i32_0, %c0_i32_1 : i32, i32, i32
  }
  func.func @transform_4(%arg0: i32) -> (i32, i32) {
    %c0_i32 = arith.constant 0 : i32
    %c0_i32_0 = arith.constant 0 : i32
    %c0_i32_1 = arith.constant 0 : i32
    return %c0_i32, %c0_i32_0 : i32, i32
  }
  func.func @transform_5(%arg0: i32) -> (i32, i32) {
    %c0_i32 = arith.constant 0 : i32
    %c0_i32_0 = arith.constant 0 : i32
    return %arg0, %c0_i32 : i32, i32
  }
}

</mosaic_0001>

<bundles_post_ra>
// kernel: tile.13
= control target key start
LH: loop header
LB: loop body
LE: loop exit
PB: predicated region body
PF: predicated region fallthrough
CT: control target
= control target key end

     0   :  { %s40_s0 = inlined_call_operand.vmem [shape: f32[4], index: 0, kind: input, shape index: {}]   ;;  %s41_s1 = inlined_call_operand.vmem [shape: f32[32,4], index: 1, kind: output, shape index: {}]  }
   0x1   :  { %v4_v0 = vld [vmem:[%s40_s0] ss:$0 sm:$0xff] }
   0x2   :  { %5 = vst [vmem:[%s41_s1] sm:$0xff] %v4_v0  ;;  %12 = vst [vmem:[%s41_s1 + $0x8] sm:$0xff] %v4_v0 }
   0x3   :  { %13 = vst [vmem:[%s41_s1 + $0x10] sm:$0xff] %v4_v0  ;;  %14 = vst [vmem:[%s41_s1 + $0x18] sm:$0xff] %v4_v0 }

// kernel: tile.14
= control target key start
LH: loop header
LB: loop body
LE: loop exit
PB: predicated region body
PF: predicated region fallthrough
CT: control target
= control target key end

     0   :  { %s261_s10 = smov 124   ;;  %s262_s11 = smov 116   ;;  %vm3_vm0 = vcmask 31744   ;;  %vm9_vm1 = vcmask 1048544   ;;  %vm15_vm2 = vcmask 1015744   ;;  %vm21_vm3 = vcmask 982944   ;;  %s401_s0 = inlined_call_operand.vmem [shape: f32[32,4], index: 0, kind: input, shape index: {}]   ;;  %s402_s1 = inlined_call_operand.vmem [shape: f32[1,128], index: 1, kind: output, shape index: {}]  }
   0x1   :  { %v199_v0 = vld [vmem:[%s401_s0 + $0x1f] sm:$0x1]   ;;  %v201_v1 = vld [vmem:[%s401_s0 + $0x1d] sm:$0x1]   ;;  %v200_v2 = vld [vmem:[%s401_s0 + $0x1e] sm:$0x1]  }
   0x2   :  { %7 = vrot.lane.b32.xlu0 %v199_v0, %s261_s10  ;;  %19 = vrot.lane.b32.xlu1 %v201_v1, %s262_s11  ;;  %v202_v3 = vld [vmem:[%s401_s0 + $0x1c] sm:$0x1]   ;;  %s263_s16 = smov 120   ;;  %s264_s17 = smov 112   ;;  %v203_v4 = vld [vmem:[%s401_s0 + $0x1b] sm:$0x1]  }
   0x3   :  { %v204_v5 = vld [vmem:[%s401_s0 + $0x1a] sm:$0x1]   ;;  %s265_s22 = smov 108   ;;  %s266_s23 = smov 104   ;;  %v205_v6 = vld [vmem:[%s401_s0 + $0x19] sm:$0x1]  }
   0x4   :  { %v206_v7 = vld [vmem:[%s401_s0 + $0x18] sm:$0x1]   ;;  %s267_s28 = smov 100   ;;  %s268_s29 = smov 96   ;;  %v207_v8 = vld [vmem:[%s401_s0 + $0x17] sm:$0x1]  }
   0x5   :  { %v208_v9 = vld [vmem:[%s401_s0 + $0x16] sm:$0x1]   ;;  %v2_v10 = vld [vmem:[%s401_s0] sm:$0x1]   ;;  %s269_s7 = smov 92   ;;  %s270_s8 = smov 88  }
   0x6   :  { %13 = vrot.lane.b32.xlu0 %v200_v2, %s263_s16  ;;  %25 = vrot.lane.b32.xlu1 %v202_v3, %s264_s17  ;;  %4 = vst.msk [vmem:[#allocation0] sm:$0x1] %vm3_vm0, %v2_v10   ;;  %v209_v11 = vld [vmem:[%s401_s0 + $0x15] sm:$0x1]   ;;  %v210_v12 = vld [vmem:[%s401_s0 + $0x14] sm:$0x1]  }
   0x7   :  { %s271_s13 = smov 84   ;;  %s272_s14 = smov 80   ;;  %v211_v13 = vld [vmem:[%s401_s0 + $0x13] sm:$0x1]   ;;  %v212_v14 = vld [vmem:[%s401_s0 + $0x12] sm:$0x1]  }
   0x8   :  { %s273_s19 = smov 76   ;;  %s274_s20 = smov 72   ;;  %v213_v15 = vld [vmem:[%s401_s0 + $0x11] sm:$0x1]   ;;  %v214_v16 = vld [vmem:[%s401_s0 + $0x10] sm:$0x1]  }
   0x9   :  { %s275_s25 = smov 68   ;;  %s276_s26 = smov 64   ;;  %v215_v17 = vld [vmem:[%s401_s0 + $0xf] sm:$0x1]   ;;  %v216_v18 = vld [vmem:[%s401_s0 + $0xe] sm:$0x1]  }
   0xa   :  { %31 = vrot.lane.b32.xlu0 %v203_v4, %s265_s22  ;;  %37 = vrot.lane.b32.xlu1 %v204_v5, %s266_s23  ;;  %s277_s2 = smov 60   ;;  %s278_s3 = smov 56   ;;  %v217_v19 = vld [vmem:[%s401_s0 + $0xd] sm:$0x1]   ;;  %v218_v20 = vld [vmem:[%s401_s0 + $0xc] sm:$0x1]  }
   0xb   :  { %s280_s9 = smov 48   ;;  %v219_v21 = vld [vmem:[%s401_s0 + $0xb] sm:$0x1]   ;;  %v220_v22 = vld [vmem:[%s401_s0 + $0xa] sm:$0x1]   ;;  %s282_s15 = smov 40  }
   0xc   :  { %v221_v23 = vld [vmem:[%s401_s0 + $0x9] sm:$0x1]   ;;  %v222_v24 = vld [vmem:[%s401_s0 + $0x8] sm:$0x1]   ;;  %s284_s21 = smov 32   ;;  %s286_s27 = smov 24  }
   0xd   :  { %v223_v25 = vld [vmem:[%s401_s0 + $0x7] sm:$0x1]   ;;  %v224_v26 = vld [vmem:[%s401_s0 + $0x6] sm:$0x1]   ;;  %v225_v27 = vld [vmem:[%s401_s0 + $0x5] sm:$0x1]  }
   0xe   :  { %43 = vrot.lane.b32.xlu0 %v205_v6, %s267_s28  ;;  %49 = vrot.lane.b32.xlu1 %v206_v7, %s268_s29  ;;  %v226_v28 = vld [vmem:[%s401_s0 + $0x4] sm:$0x1]   ;;  %s288_s4 = smov 16   ;;  %v227_v29 = vld [vmem:[%s401_s0 + $0x3] sm:$0x1]   ;;  %s290_s10 = smov 8  }
   0xf   :  { %v228_v30 = vld [vmem:[%s401_s0 + $0x2] sm:$0x1]   ;;  %v229_v31 = vld [vmem:[%s401_s0 + $0x1] sm:$0x1]   ;;  %s291_s0 = smov 4   ;;  %vm27_vm4 = vcmask 950144  }
  0x10   :  { %vm33_vm5 = vcmask 917344   ;;  %vm39_vm6 = vcmask 884544   ;;  %vm45_vm7 = vcmask 851744   ;;  %vm51_vm8 = vcmask 818944  }
  0x11   :  { %vm57_vm9 = vcmask 786144   ;;  %vm63_vm10 = vcmask 753344   ;;  %vm69_vm11 = vcmask 720544   ;;  %vm75_vm12 = vcmask 687744  }
  0x12   :  { %55 = vrot.lane.b32.xlu0 %v207_v8, %s269_s7  ;;  %61 = vrot.lane.b32.xlu1 %v208_v9, %s270_s8  ;;  %s279_s8 = smov 52   ;;  %vm81_vm13 = vcmask 654944   ;;  %vm87_vm14 = vcmask 622144   ;;  %vm93_vm15 = vcmask 589344   ;;  %vm99_vm0 = vcmask 556544  }
  0x16   :  { %67 = vrot.lane.b32.xlu0 %v209_v11, %s271_s13  ;;  %73 = vrot.lane.b32.xlu1 %v210_v12, %s272_s14  ;;  %s281_s14 = smov 44  }
  0x1a   :  { %79 = vrot.lane.b32.xlu0 %v211_v13, %s273_s19  ;;  %85 = vrot.lane.b32.xlu1 %v212_v14, %s274_s20  ;;  %s283_s20 = smov 36  }
  0x1e   :  { %91 = vrot.lane.b32.xlu0 %v213_v15, %s275_s25  ;;  %97 = vrot.lane.b32.xlu1 %v214_v16, %s276_s26  ;;  %s285_s26 = smov 28  }
  0x22   :  { %103 = vrot.lane.b32.xlu0 %v215_v17, %s277_s2  ;;  %109 = vrot.lane.b32.xlu1 %v216_v18, %s278_s3  ;;  %s287_s3 = smov 20  }
  0x26   :  { %115 = vrot.lane.b32.xlu0 %v217_v19, %s279_s8  ;;  %121 = vrot.lane.b32.xlu1 %v218_v20, %s280_s9  ;;  %s289_s9 = smov 12  }
  0x2a   :  { %127 = vrot.lane.b32.xlu0 %v219_v21, %s281_s14  ;;  %133 = vrot.lane.b32.xlu1 %v220_v22, %s282_s15 }
  0x2e   :  { %139 = vrot.lane.b32.xlu0 %v221_v23, %s283_s20  ;;  %145 = vrot.lane.b32.xlu1 %v222_v24, %s284_s21 }
  0x32   :  { %151 = vrot.lane.b32.xlu0 %v223_v25, %s285_s26  ;;  %157 = vrot.lane.b32.xlu1 %v224_v26, %s286_s27 }
  0x36   :  { %163 = vrot.lane.b32.xlu0 %v225_v27, %s287_s3  ;;  %169 = vrot.lane.b32.xlu1 %v226_v28, %s288_s4 }
  0x3a   :  { %175 = vrot.lane.b32.xlu0 %v227_v29, %s289_s9  ;;  %181 = vrot.lane.b32.xlu1 %v228_v30, %s290_s10 }
  0x3e   :  { %187 = vrot.lane.b32.xlu0 %v229_v31, %s291_s0 }
  0x74   :  { %v8_v32 = vpop.permute.xlu0 %7   ;;  %v20_v33 = vpop.permute.xlu1 %19  }
  0x75   :  { %10 = vst.msk [vmem:[#allocation0] sm:$0x1] %vm9_vm1, %v8_v32   ;;  %vm105_vm1 = vcmask 523744  }
  0x78   :  { %v14_v34 = vpop.permute.xlu0 %13   ;;  %v26_v35 = vpop.permute.xlu1 %25  }
  0x79   :  { %16 = vst.msk [vmem:[#allocation0] sm:$0x1] %vm15_vm2, %v14_v34   ;;  %vm111_vm2 = vcmask 490944  }
  0x7a   :  { %22 = vst.msk [vmem:[#allocation0] sm:$0x1] %vm21_vm3, %v20_v33   ;;  %vm117_vm3 = vcmask 458144  }
  0x7b   :  { %28 = vst.msk [vmem:[#allocation0] sm:$0x1] %vm27_vm4, %v26_v35   ;;  %vm123_vm4 = vcmask 425344  }
  0x7c   :  { %v32_v36 = vpop.permute.xlu0 %31   ;;  %v38_v37 = vpop.permute.xlu1 %37  }
  0x7d   :  { %34 = vst.msk [vmem:[#allocation0] sm:$0x1] %vm33_vm5, %v32_v36   ;;  %vm129_vm5 = vcmask 392544  }
  0x7e   :  { %40 = vst.msk [vmem:[#allocation0] sm:$0x1] %vm39_vm6, %v38_v37   ;;  %vm135_vm6 = vcmask 359744  }
  0x80   :  { %v44_v38 = vpop.permute.xlu0 %43   ;;  %v50_v39 = vpop.permute.xlu1 %49  }
  0x81   :  { %46 = vst.msk [vmem:[#allocation0] sm:$0x1] %vm45_vm7, %v44_v38   ;;  %vm141_vm7 = vcmask 326944  }
  0x82   :  { %52 = vst.msk [vmem:[#allocation0] sm:$0x1] %vm51_vm8, %v50_v39   ;;  %vm147_vm8 = vcmask 294144  }
  0x84   :  { %v56_v40 = vpop.permute.xlu0 %55   ;;  %v62_v41 = vpop.permute.xlu1 %61  }
  0x85   :  { %58 = vst.msk [vmem:[#allocation0] sm:$0x1] %vm57_vm9, %v56_v40   ;;  %vm153_vm9 = vcmask 261344  }
  0x86   :  { %64 = vst.msk [vmem:[#allocation0] sm:$0x1] %vm63_vm10, %v62_v41   ;;  %vm159_vm10 = vcmask 228544  }
  0x88   :  { %v68_v42 = vpop.permute.xlu0 %67   ;;  %v74_v43 = vpop.permute.xlu1 %73  }
  0x89   :  { %70 = vst.msk [vmem:[#allocation0] sm:$0x1] %vm69_vm11, %v68_v42   ;;  %vm165_vm11 = vcmask 195744  }
  0x8a   :  { %76 = vst.msk [vmem:[#allocation0] sm:$0x1] %vm75_vm12, %v74_v43   ;;  %vm171_vm12 = vcmask 162944  }
  0x8c   :  { %v80_v44 = vpop.permute.xlu0 %79   ;;  %v86_v45 = vpop.permute.xlu1 %85  }
  0x8d   :  { %82 = vst.msk [vmem:[#allocation0] sm:$0x1] %vm81_vm13, %v80_v44   ;;  %vm177_vm13 = vcmask 130144  }
  0x8e   :  { %88 = vst.msk [vmem:[#allocation0] sm:$0x1] %vm87_vm14, %v86_v45   ;;  %vm183_vm14 = vcmask 97344  }
  0x90   :  { %v92_v46 = vpop.permute.xlu0 %91   ;;  %v98_v47 = vpop.permute.xlu1 %97  }
  0x91   :  { %94 = vst.msk [vmem:[#allocation0] sm:$0x1] %vm93_vm15, %v92_v46   ;;  %vm189_vm15 = vcmask 64544  }
  0x92   :  { %100 = vst.msk [vmem:[#allocation0] sm:$0x1] %vm99_vm0, %v98_v47  }
  0x94   :  { %v104_v48 = vpop.permute.xlu0 %103   ;;  %v110_v49 = vpop.permute.xlu1 %109  }
  0x95   :  { %106 = vst.msk [vmem:[#allocation0] sm:$0x1] %vm105_vm1, %v104_v48  }
  0x96   :  { %112 = vst.msk [vmem:[#allocation0] sm:$0x1] %vm111_vm2, %v110_v49  }
  0x98   :  { %v116_v50 = vpop.permute.xlu0 %115   ;;  %v122_v51 = vpop.permute.xlu1 %121  }
  0x99   :  { %118 = vst.msk [vmem:[#allocation0] sm:$0x1] %vm117_vm3, %v116_v50  }
  0x9a   :  { %124 = vst.msk [vmem:[#allocation0] sm:$0x1] %vm123_vm4, %v122_v51  }
  0x9c   :  { %v128_v52 = vpop.permute.xlu0 %127   ;;  %v134_v53 = vpop.permute.xlu1 %133  }
  0x9d   :  { %130 = vst.msk [vmem:[#allocation0] sm:$0x1] %vm129_vm5, %v128_v52  }
  0x9e   :  { %136 = vst.msk [vmem:[#allocation0] sm:$0x1] %vm135_vm6, %v134_v53  }
  0xa0   :  { %v140_v54 = vpop.permute.xlu0 %139   ;;  %v146_v55 = vpop.permute.xlu1 %145  }
  0xa1   :  { %142 = vst.msk [vmem:[#allocation0] sm:$0x1] %vm141_vm7, %v140_v54  }
  0xa2   :  { %148 = vst.msk [vmem:[#allocation0] sm:$0x1] %vm147_vm8, %v146_v55  }
  0xa4   :  { %v152_v56 = vpop.permute.xlu0 %151   ;;  %v158_v57 = vpop.permute.xlu1 %157  }
  0xa5   :  { %154 = vst.msk [vmem:[#allocation0] sm:$0x1] %vm153_vm9, %v152_v56  }
  0xa6   :  { %160 = vst.msk [vmem:[#allocation0] sm:$0x1] %vm159_vm10, %v158_v57  }
  0xa8   :  { %v164_v58 = vpop.permute.xlu0 %163   ;;  %v170_v59 = vpop.permute.xlu1 %169  }
  0xa9   :  { %166 = vst.msk [vmem:[#allocation0] sm:$0x1] %vm165_vm11, %v164_v58  }
  0xaa   :  { %172 = vst.msk [vmem:[#allocation0] sm:$0x1] %vm171_vm12, %v170_v59  }
  0xac   :  { %v176_v60 = vpop.permute.xlu0 %175   ;;  %v182_v61 = vpop.permute.xlu1 %181  }
  0xad   :  { %178 = vst.msk [vmem:[#allocation0] sm:$0x1] %vm177_vm13, %v176_v60  }
  0xae   :  { %184 = vst.msk [vmem:[#allocation0] sm:$0x1] %vm183_vm14, %v182_v61  }
  0xb0   :  { %v188_v62 = vpop.permute.xlu0 %187  }
  0xb1   :  { %190 = vst.msk [vmem:[#allocation0] sm:$0x1] %vm189_vm15, %v188_v62  }
  0xb8   :  { %v195_v63 = vld [vmem:[#allocation0] sm:$0x1] }
  0xb9   :  { %198 = vst [vmem:[%s402_s1] sm:$0x1] %v195_v63 }

// kernel: basic_block_forward_nchw.1
= control target key start
LH: loop header
LB: loop body
LE: loop exit
PB: predicated region body
PF: predicated region fallthrough
CT: control target
= control target key end

     0   :  { %s1291_s18 = smov 0   ;;  %s1736_s0 = inlined_call_operand.vmem [shape: f32[16,128], index: 0, kind: input, shape index: {}]   ;;  %s1737_s1 = inlined_call_operand.vmem [shape: f32[3,128,128], index: 1, kind: input, shape index: {}]   ;;  %s1738_s2 = inlined_call_operand.vmem [shape: f32[1,128], index: 2, kind: input, shape index: {}]   ;;  %s1739_s3 = inlined_call_operand.vmem [shape: f32[3,128,128], index: 3, kind: input, shape index: {}]   ;;  %s1740_s4 = inlined_call_operand.vmem [shape: f32[1,128], index: 4, kind: input, shape index: {}]   ;;  %s1741_s5 = inlined_call_operand.vmem [shape: f32[16,128], index: 5, kind: output, shape index: {}]  }
   0x1 LB: > { %s852_s19 = sadd.s32 4294967295, %s1257_s18   ;;  %p856_p0 = scmp.ge.s32.totalorder %s1257_s18, 1  ;;  %s1257_s18 = sphi %s1291_s18, %s15_s18  }
   0x2   : > { %p186_p1 = scmp.lt.s32.totalorder %s1257_s18, 3 }
   0x4   : > { %p187_p2 = pnand %p856_p0, %p186_p1 }
   0x5   : > { %p212_p3 = scmp.lt.s32.totalorder (!%p187_p2), %s852_s19, 1 }
   0x6   : > { %190 = sbr.rel (%p187_p2) target bundleno = 521 (0x209), region = 40 }
   0xb   : > { %v280_v0 = vld [vmem:[%s1737_s1 + $0x78] sm:$0xff]  ;;  %v1259_v2 = vmov 0.0   ;;  %v279_v3 = vld [vmem:[%s1737_s1 + $0x70] sm:$0xff]  ;;  %s1743_s19 = smov (!%p212_p3, %s852_s19), 1  ;;  %v278_v5 = vld [vmem:[%s1737_s1 + $0x68] sm:$0xff]  ;;  %vm1260_vm0 = vmmov 0  }
   0xc   : > { %v876_v1 = vld [vmem:[%s1737_s1 + $0xf8] sm:$0xff]  ;;  %1031 = vmatprep.subr.mxu0 %v1259_v2  ;;  %220 = vst [vmem:[#allocation2 + $0x7] sm:$0x1] %v1259_v2  ;;  %221 = vst [vmem:[#allocation2 + $0x10] sm:$0x1] %v1259_v2  ;;  %1066 = vmatprep.subr.mxu1 %v1259_v2  ;;  %v875_v4 = vld [vmem:[%s1737_s1 + $0xf0] sm:$0xff] }
   0xd   : > { %222 = vst [vmem:[#allocation3 + $0x7] sm:$0x1] %v1259_v2  ;;  %223 = vst [vmem:[#allocation3 + $0x10] sm:$0x1] %v1259_v2  ;;  %1032 = vmatpush3.msra.mxu0 %v280_v0  ;;  %1067 = vmatpush3.msra.mxu1 %v876_v1  ;;  %v874_v6 = vld [vmem:[%s1737_s1 + $0xe8] sm:$0xff]  ;;  %s857_s7 = sshll.u32 %s1743_s19, 3 }
   0xe   : > { %1033 = vmatprep.subr.mxu0 %v1259_v2  ;;  %1068 = vmatprep.subr.mxu1 %v1259_v2  ;;  %v277_v7 = vld [vmem:[%s1737_s1 + $0x60] sm:$0xff]  ;;  %v276_v9 = vld [vmem:[%s1737_s1 + $0x58] sm:$0xff]  ;;  %s215_s20 = scalar_lea.vmem %s1736_s0, %s857_s7  ;;  %v275_v11 = vld [vmem:[%s1737_s1 + $0x50] sm:$0xff]  ;;  %s219_s23 = scalar_lea.vmem %s1741_s5, %s857_s7 }
   0xf   : > { %1034 = vmatpush3.msra.mxu0 %v279_v3  ;;  %1069 = vmatpush3.msra.mxu1 %v875_v4  ;;  %v873_v8 = vld [vmem:[%s1737_s1 + $0xe0] sm:$0xff]  ;;  %v872_v10 = vld [vmem:[%s1737_s1 + $0xd8] sm:$0xff]  ;;  %v871_v12 = vld [vmem:[%s1737_s1 + $0xd0] sm:$0xff] }
  0x10   : > { %1035 = vmatprep.subr.mxu0 %v1259_v2  ;;  %1070 = vmatprep.subr.mxu1 %v1259_v2  ;;  %v1357_v13 = vld [vmem:[%s215_s20] sm:$0xff]  ;;  %v274_v14 = vld [vmem:[%s1737_s1 + $0x48] sm:$0xff]  ;;  %v272_v18 = vld [vmem:[%s1737_s1 + $0x38] sm:$0xff] }
  0x11   : > { %1036 = vmatpush3.msra.mxu0 %v278_v5  ;;  %1071 = vmatpush3.msra.mxu1 %v874_v6  ;;  %v870_v15 = vld [vmem:[%s1737_s1 + $0xc8] sm:$0xff]  ;;  %225 = vst [vmem:[#allocation2 + $0x8] sm:$0xff] %v1357_v13  ;;  %v273_v16 = vld [vmem:[%s1737_s1 + $0x40] sm:$0xff]  ;;  %v868_v19 = vld [vmem:[%s1737_s1 + $0xb8] sm:$0xff] }
  0x12   : > { %1037 = vmatprep.subr.mxu0 %v1259_v2  ;;  %1072 = vmatprep.subr.mxu1 %v1259_v2  ;;  %v869_v17 = vld [vmem:[%s1737_s1 + $0xc0] sm:$0xff]  ;;  %v271_v20 = vld [vmem:[%s1737_s1 + $0x30] sm:$0xff]  ;;  %v270_v22 = vld [vmem:[%s1737_s1 + $0x28] sm:$0xff] }
  0x13   : > { %1038 = vmatpush3.msra.mxu0 %v277_v7  ;;  %1073 = vmatpush3.msra.mxu1 %v873_v8  ;;  %v867_v21 = vld [vmem:[%s1737_s1 + $0xb0] sm:$0xff]  ;;  %v866_v23 = vld [vmem:[%s1737_s1 + $0xa8] sm:$0xff]  ;;  %v269_v24 = vld [vmem:[%s1737_s1 + $0x20] sm:$0xff] }
  0x14   : > { %1039 = vmatprep.subr.mxu0 %v1259_v2  ;;  %1074 = vmatprep.subr.mxu1 %v1259_v2  ;;  %v865_v25 = vld [vmem:[%s1737_s1 + $0xa0] sm:$0xff]  ;;  %v268_v26 = vld [vmem:[%s1737_s1 + $0x18] sm:$0xff]  ;;  %v267_v28 = vld [vmem:[%s1737_s1 + $0x10] sm:$0xff] }
  0x15   : > { %1040 = vmatpush3.msra.mxu0 %v276_v9  ;;  %1075 = vmatpush3.msra.mxu1 %v872_v10  ;;  %v864_v27 = vld [vmem:[%s1737_s1 + $0x98] sm:$0xff]  ;;  %v863_v29 = vld [vmem:[%s1737_s1 + $0x90] sm:$0xff]  ;;  %v266_v30 = vld [vmem:[%s1737_s1 + $0x8] sm:$0xff] }
  0x16   : > { %1041 = vmatprep.subr.mxu0 %v1259_v2  ;;  %1076 = vmatprep.subr.mxu1 %v1259_v2  ;;  %v862_v31 = vld [vmem:[%s1737_s1 + $0x88] sm:$0xff]  ;;  %v265_v32 = vld [vmem:[%s1737_s1] sm:$0xff]  ;;  %v892_v34 = vld [vmem:[%s1737_s1 + $0x178] sm:$0xff] }
  0x17   : > { %1042 = vmatpush3.msra.mxu0 %v275_v11  ;;  %1077 = vmatpush3.msra.mxu1 %v871_v12  ;;  %v861_v35 = vld [vmem:[%s1737_s1 + $0x80] sm:$0xff]  ;;  %v891_v36 = vld [vmem:[%s1737_s1 + $0x170] sm:$0xff]  ;;  %v890_v37 = vld [vmem:[%s1737_s1 + $0x168] sm:$0xff] }
  0x18   : > { %1043 = vmatprep.subr.mxu0 %v1259_v2  ;;  %1078 = vmatprep.subr.mxu1 %v1259_v2  ;;  %v264_v33 = vld [vmem:[#allocation2 + $0x7] sm:$0xff]  ;;  %v888_v39 = vld [vmem:[%s1737_s1 + $0x158] sm:$0xff]  ;;  %v887_v40 = vld [vmem:[%s1737_s1 + $0x150] sm:$0xff] }
  0x19   : > { %1044 = vmatpush3.msra.mxu0 %v274_v14  ;;  %1079 = vmatpush3.msra.mxu1 %v870_v15  ;;  %v889_v38 = vld [vmem:[%s1737_s1 + $0x160] sm:$0xff]  ;;  %v886_v41 = vld [vmem:[%s1737_s1 + $0x148] sm:$0xff]  ;;  %v884_v43 = vld [vmem:[%s1737_s1 + $0x138] sm:$0xff] }
  0x1a   : > { %1045 = vmatprep.subr.mxu0 %v1259_v2  ;;  %1080 = vmatprep.subr.mxu1 %v1259_v2  ;;  %v885_v42 = vld [vmem:[%s1737_s1 + $0x140] sm:$0xff]  ;;  %v883_v44 = vld [vmem:[%s1737_s1 + $0x130] sm:$0xff]  ;;  %v882_v45 = vld [vmem:[%s1737_s1 + $0x128] sm:$0xff] }
  0x1b   : > { %1046 = vmatpush3.msra.mxu0 %v273_v16  ;;  %1081 = vmatpush3.msra.mxu1 %v869_v17  ;;  %v881_v46 = vld [vmem:[%s1737_s1 + $0x120] sm:$0xff]  ;;  %v880_v47 = vld [vmem:[%s1737_s1 + $0x118] sm:$0xff]  ;;  %v879_v48 = vld [vmem:[%s1737_s1 + $0x110] sm:$0xff] }
  0x1c   : > { %1047 = vmatprep.subr.mxu0 %v1259_v2  ;;  %1082 = vmatprep.subr.mxu1 %v1259_v2  ;;  %v878_v49 = vld [vmem:[%s1737_s1 + $0x108] sm:$0xff]  ;;  %v877_v50 = vld [vmem:[%s1737_s1 + $0x100] sm:$0xff]  ;;  %v556_v52 = vld [vmem:[%s1739_s3 + $0x78] sm:$0xff] }
  0x1d   : > { %1048 = vmatpush3.msra.mxu0 %v272_v18  ;;  %1083 = vmatpush3.msra.mxu1 %v868_v19  ;;  %v422_v51 = vld [vmem:[#allocation2 + $0x9] sm:$0xff]  ;;  %v909_v53 = vld [vmem:[%s1739_s3 + $0xf8] sm:$0xff]  ;;  %v553_v58 = vld [vmem:[%s1739_s3 + $0x60] sm:$0xff] }
  0x1e   : > { %1049 = vmatprep.subr.mxu0 %v1259_v2  ;;  %1084 = vmatprep.subr.mxu1 %v1259_v2  ;;  %v555_v54 = vld [vmem:[%s1739_s3 + $0x70] sm:$0xff]  ;;  %v554_v56 = vld [vmem:[%s1739_s3 + $0x68] sm:$0xff]  ;;  %v906_v59 = vld [vmem:[%s1739_s3 + $0xe0] sm:$0xff] }
  0x1f   : > { %1050 = vmatpush3.msra.mxu0 %v271_v20  ;;  %1085 = vmatpush3.msra.mxu1 %v867_v21  ;;  %v908_v55 = vld [vmem:[%s1739_s3 + $0xf0] sm:$0xff]  ;;  %v907_v57 = vld [vmem:[%s1739_s3 + $0xe8] sm:$0xff]  ;;  %v552_v60 = vld [vmem:[%s1739_s3 + $0x58] sm:$0xff] }
  0x20   : > { %1051 = vmatprep.subr.mxu0 %v1259_v2  ;;  %1086 = vmatprep.subr.mxu1 %v1259_v2  ;;  %v905_v61 = vld [vmem:[%s1739_s3 + $0xd8] sm:$0xff]  ;;  %v551_v62 = vld [vmem:[%s1739_s3 + $0x50] sm:$0xff]  ;;  %v550_v0 = vld [vmem:[%s1739_s3 + $0x48] sm:$0xff] }
  0x21   : > { %1052 = vmatpush3.msra.mxu0 %v270_v22  ;;  %1087 = vmatpush3.msra.mxu1 %v866_v23  ;;  %v904_v63 = vld [vmem:[%s1739_s3 + $0xd0] sm:$0xff]  ;;  %v903_v1 = vld [vmem:[%s1739_s3 + $0xc8] sm:$0xff]  ;;  %v549_v3 = vld [vmem:[%s1739_s3 + $0x40] sm:$0xff] }
  0x22   : > { %1053 = vmatprep.subr.mxu0 %v1259_v2  ;;  %1088 = vmatprep.subr.mxu1 %v1259_v2  ;;  %v902_v4 = vld [vmem:[%s1739_s3 + $0xc0] sm:$0xff]  ;;  %v901_v5 = vld [vmem:[%s1739_s3 + $0xb8] sm:$0xff]  ;;  %v900_v6 = vld [vmem:[%s1739_s3 + $0xb0] sm:$0xff] }
  0x23   : > { %1054 = vmatpush3.msra.mxu0 %v269_v24  ;;  %1089 = vmatpush3.msra.mxu1 %v865_v25  ;;  %v899_v7 = vld [vmem:[%s1739_s3 + $0xa8] sm:$0xff]  ;;  %v898_v8 = vld [vmem:[%s1739_s3 + $0xa0] sm:$0xff]  ;;  %v548_v9 = vld [vmem:[%s1739_s3 + $0x38] sm:$0xff] }
  0x24   : > { %1055 = vmatprep.subr.mxu0 %v1259_v2  ;;  %1090 = vmatprep.subr.mxu1 %v1259_v2  ;;  %v897_v10 = vld [vmem:[%s1739_s3 + $0x98] sm:$0xff]  ;;  %v547_v11 = vld [vmem:[%s1739_s3 + $0x30] sm:$0xff]  ;;  %v546_v14 = vld [vmem:[%s1739_s3 + $0x28] sm:$0xff] }
  0x25   : > { %1056 = vmatpush3.msra.mxu0 %v268_v26  ;;  %1091 = vmatpush3.msra.mxu1 %v864_v27  ;;  %v896_v12 = vld [vmem:[%s1739_s3 + $0x90] sm:$0xff]  ;;  %v895_v15 = vld [vmem:[%s1739_s3 + $0x88] sm:$0xff]  ;;  %v545_v16 = vld [vmem:[%s1739_s3 + $0x20] sm:$0xff]  ;;  %v226_v26 = vlaneseq }
  0x26   : > { %1057 = vmatprep.subr.mxu0 %v1259_v2  ;;  %1092 = vmatprep.subr.mxu1 %v1259_v2  ;;  %v894_v17 = vld [vmem:[%s1739_s3 + $0x80] sm:$0xff]  ;;  %v544_v18 = vld [vmem:[%s1739_s3 + $0x18] sm:$0xff]  ;;  %v543_v19 = vld [vmem:[%s1739_s3 + $0x10] sm:$0xff] }
  0x27   : > { %1058 = vmatpush3.msra.mxu0 %v267_v28  ;;  %1093 = vmatpush3.msra.mxu1 %v863_v29  ;;  %v542_v20 = vld [vmem:[%s1739_s3 + $0x8] sm:$0xff]  ;;  %v541_v21 = vld [vmem:[%s1739_s3] sm:$0xff]  ;;  %v227_v27 = vshrl.u32 %v226_v26, 7 }
  0x28   : > { %1059 = vmatprep.subr.mxu0 %v1259_v2  ;;  %1063 = vmatprep.mubr.msk.f32.mxu0 %vm1260_vm0, %v1259_v2 }
  0x29   : > { %1060 = vmatpush3.msra.mxu0 %v266_v30  ;;  %1094 = vmatprep.subr.mxu1 %v1259_v2  ;;  %v232_v28 = vand.u32 7, %v227_v27 }
  0x2a   : > { %1061 = vmatprep.subr.mxu0 %v1259_v2  ;;  %1095 = vmatpush3.msra.mxu1 %v862_v31 }
  0x2b   : > { %1062 = vmatpush3.msra.mxu0 %v265_v32  ;;  %1096 = vmatprep.subr.mxu1 %v1259_v2  ;;  %vm240_vm1 = vcmp.ne.s32.totalorder %v232_v28, 0  ;;  %vm243_vm2 = vcmp.ne.s32.totalorder %v232_v28, 7 }
  0x2c   : > { %1064 = vmatmul.mubr.f32.vlgmr.msra.gmra.mxu0 %v264_v33  ;;  %1101 = vmatprep.subr.mxu0 %v1259_v2  ;;  %v1647_v29 = vsel %vm240_vm1, 1.0, %v1259_v2  ;;  %v1651_v31 = vsel %vm243_vm2, 1.0, %v1259_v2 }
  0x2d   : > { %1102 = vmatpush3.msra.mxu0 %v892_v34  ;;  %1097 = vmatpush3.msra.mxu1 %v861_v35  ;;  %v893_v35 = vld [vmem:[%s1738_s2] ss:$0 sm:$0xff] }
  0x2e   : > { %1098 = vmatprep.mubr.msk.f32.mxu1 %vm1260_vm0, %v1259_v2  ;;  %1103 = vmatprep.subr.mxu0 %v1259_v2 }
  0x2f   : > { %1099 = vmatmul.mubr.f32.vlgmr.msra.gmra.mxu1 %v1357_v13  ;;  %1104 = vmatpush3.msra.mxu0 %v891_v36 }
  0x30   : > { %1105 = vmatprep.subr.mxu0 %v1259_v2  ;;  %1133 = vmatprep.mubr.msk.f32.mxu0 %vm1260_vm0, %v1259_v2 }
  0x31   : > { %1106 = vmatpush3.msra.mxu0 %v890_v37  ;;  %1136 = vmatprep.subr.mxu1 %v1259_v2 }
  0x32   : > { %1107 = vmatprep.subr.mxu0 %v1259_v2  ;;  %1168 = vmatprep.mubr.msk.f32.mxu1 %vm1260_vm0, %v1259_v2 }
  0x33   : > { %1108 = vmatpush3.msra.mxu0 %v889_v38  ;;  %1137 = vmatpush3.msra.mxu1 %v556_v52  ;;  %v914_v52 = vld [vmem:[%s1739_s3 + $0x120] sm:$0xff] }
  0x34   : > { %1109 = vmatprep.subr.mxu0 %v1259_v2  ;;  %1138 = vmatprep.subr.mxu1 %v1259_v2 }
  0x35   : > { %1110 = vmatpush3.msra.mxu0 %v888_v39  ;;  %1139 = vmatpush3.msra.mxu1 %v555_v54  ;;  %v912_v54 = vld [vmem:[%s1739_s3 + $0x110] sm:$0xff] }
  0x36   : > { %1111 = vmatprep.subr.mxu0 %v1259_v2  ;;  %1140 = vmatprep.subr.mxu1 %v1259_v2 }
  0x37   : > { %1112 = vmatpush3.msra.mxu0 %v887_v40  ;;  %1141 = vmatpush3.msra.mxu1 %v554_v56  ;;  %v925_v40 = vld [vmem:[%s1739_s3 + $0x178] sm:$0xff]  ;;  %v910_v56 = vld [vmem:[%s1739_s3 + $0x100] sm:$0xff] }
  0x38   : > { %1113 = vmatprep.subr.mxu0 %v1259_v2  ;;  %1142 = vmatprep.subr.mxu1 %v1259_v2 }
  0x39   : > { %1114 = vmatpush3.msra.mxu0 %v886_v41  ;;  %1143 = vmatpush3.msra.mxu1 %v553_v58 }
  0x3a   : > { %1115 = vmatprep.subr.mxu0 %v1259_v2  ;;  %1144 = vmatprep.subr.mxu1 %v1259_v2 }
  0x3b   : > { %1116 = vmatpush3.msra.mxu0 %v885_v42  ;;  %1145 = vmatpush3.msra.mxu1 %v552_v60  ;;  %v924_v42 = vld [vmem:[%s1739_s3 + $0x170] sm:$0xff] }
  0x3c   : > { %1117 = vmatprep.subr.mxu0 %v1259_v2  ;;  %1146 = vmatprep.subr.mxu1 %v1259_v2 }
  0x3d   : > { %1118 = vmatpush3.msra.mxu0 %v884_v43  ;;  %1147 = vmatpush3.msra.mxu1 %v551_v62  ;;  %v923_v43 = vld [vmem:[%s1739_s3 + $0x168] sm:$0xff] }
  0x3e   : > { %1119 = vmatprep.subr.mxu0 %v1259_v2  ;;  %1148 = vmatprep.subr.mxu1 %v1259_v2 }
  0x3f   : > { %1120 = vmatpush3.msra.mxu0 %v883_v44  ;;  %1149 = vmatpush3.msra.mxu1 %v550_v0  ;;  %v922_v44 = vld [vmem:[%s1739_s3 + $0x160] sm:$0xff] }
  0x40   : > { %1121 = vmatprep.subr.mxu0 %v1259_v2  ;;  %1150 = vmatprep.subr.mxu1 %v1259_v2 }
  0x41   : > { %1122 = vmatpush3.msra.mxu0 %v882_v45  ;;  %1151 = vmatpush3.msra.mxu1 %v549_v3  ;;  %v921_v45 = vld [vmem:[%s1739_s3 + $0x158] sm:$0xff]  ;;  %v926_v3 = vld [vmem:[%s1740_s4] ss:$0 sm:$0xff] }
  0x42   : > { %1123 = vmatprep.subr.mxu0 %v1259_v2  ;;  %1152 = vmatprep.subr.mxu1 %v1259_v2 }
  0x43   : > { %1124 = vmatpush3.msra.mxu0 %v881_v46  ;;  %1153 = vmatpush3.msra.mxu1 %v548_v9  ;;  %v920_v46 = vld [vmem:[%s1739_s3 + $0x150] sm:$0xff] }
  0x44   : > { %1125 = vmatprep.subr.mxu0 %v1259_v2  ;;  %1154 = vmatprep.subr.mxu1 %v1259_v2 }
  0x45   : > { %1126 = vmatpush3.msra.mxu0 %v880_v47  ;;  %1155 = vmatpush3.msra.mxu1 %v547_v11  ;;  %v919_v47 = vld [vmem:[%s1739_s3 + $0x148] sm:$0xff] }
  0x46   : > { %1127 = vmatprep.subr.mxu0 %v1259_v2  ;;  %1156 = vmatprep.subr.mxu1 %v1259_v2 }
  0x47   : > { %1128 = vmatpush3.msra.mxu0 %v879_v48  ;;  %1157 = vmatpush3.msra.mxu1 %v546_v14  ;;  %v918_v48 = vld [vmem:[%s1739_s3 + $0x140] sm:$0xff] }
  0x48   : > { %1129 = vmatprep.subr.mxu0 %v1259_v2  ;;  %1158 = vmatprep.subr.mxu1 %v1259_v2 }
  0x49   : > { %1130 = vmatpush3.msra.mxu0 %v878_v49  ;;  %1159 = vmatpush3.msra.mxu1 %v545_v16  ;;  %v917_v49 = vld [vmem:[%s1739_s3 + $0x138] sm:$0xff] }
  0x4a   : > { %1131 = vmatprep.subr.mxu0 %v1259_v2  ;;  %1160 = vmatprep.subr.mxu1 %v1259_v2 }
  0x4b   : > { %1132 = vmatpush3.msra.mxu0 %v877_v50  ;;  %1161 = vmatpush3.msra.mxu1 %v544_v18  ;;  %v916_v50 = vld [vmem:[%s1739_s3 + $0x130] sm:$0xff] }
  0x4c   : > { %1134 = vmatmul.mubr.f32.vlgmr.msra.gmra.mxu0 %v422_v51  ;;  %1171 = vmatprep.subr.mxu0 %v1259_v2  ;;  %v915_v51 = vld [vmem:[%s1739_s3 + $0x128] sm:$0xff] }
  0x4d   : > { %1203 = vmatprep.mubr.msk.f32.mxu0 %vm1260_vm0, %v1259_v2  ;;  %1172 = vmatpush3.msra.mxu0 %v909_v53  ;;  %v913_v53 = vld [vmem:[%s1739_s3 + $0x118] sm:$0xff] }
  0x4e   : > { %1173 = vmatprep.subr.mxu0 %v1259_v2  ;;  %1162 = vmatprep.subr.mxu1 %v1259_v2 }
  0x4f   : > { %1174 = vmatpush3.msra.mxu0 %v908_v55  ;;  %1163 = vmatpush3.msra.mxu1 %v543_v19  ;;  %v911_v55 = vld [vmem:[%s1739_s3 + $0x108] sm:$0xff] }
  0x50   : > { %1175 = vmatprep.subr.mxu0 %v1259_v2  ;;  %1164 = vmatprep.subr.mxu1 %v1259_v2 }
  0x51   : > { %1176 = vmatpush3.msra.mxu0 %v907_v57  ;;  %1165 = vmatpush3.msra.mxu1 %v542_v20 }
  0x52   : > { %1177 = vmatprep.subr.mxu0 %v1259_v2  ;;  %1166 = vmatprep.subr.mxu1 %v1259_v2 }
  0x53   : > { %1178 = vmatpush3.msra.mxu0 %v906_v59  ;;  %1167 = vmatpush3.msra.mxu1 %v541_v21 }
  0x54   : > { %1179 = vmatprep.subr.mxu0 %v1259_v2  ;;  %1206 = vmatprep.subr.mxu1 %v1259_v2 }
  0x55   : > { %1180 = vmatpush3.msra.mxu0 %v905_v61 }
  0x56   : > { %1181 = vmatprep.subr.mxu0 %v1259_v2 }
  0x57   : > { %1182 = vmatpush3.msra.mxu0 %v904_v63 }
  0x58   : > { %1183 = vmatprep.subr.mxu0 %v1259_v2 }
  0x59   : > { %1184 = vmatpush3.msra.mxu0 %v903_v1 }
  0x5a   : > { %1185 = vmatprep.subr.mxu0 %v1259_v2 }
  0x5b   : > { %1186 = vmatpush3.msra.mxu0 %v902_v4 }
  0x5c   : > { %1187 = vmatprep.subr.mxu0 %v1259_v2 }
  0x5d   : > { %1188 = vmatpush3.msra.mxu0 %v901_v5 }
  0x5e   : > { %1189 = vmatprep.subr.mxu0 %v1259_v2 }
  0x5f   : > { %1190 = vmatpush3.msra.mxu0 %v900_v6 }
  0x60   : > { %1191 = vmatprep.subr.mxu0 %v1259_v2 }
  0x61   : > { %1192 = vmatpush3.msra.mxu0 %v899_v7 }
  0x62   : > { %1193 = vmatprep.subr.mxu0 %v1259_v2 }
  0x63   : > { %1194 = vmatpush3.msra.mxu0 %v898_v8 }
  0x64   : > { %1195 = vmatprep.subr.mxu0 %v1259_v2 }
  0x65   : > { %1196 = vmatpush3.msra.mxu0 %v897_v10 }
  0x66   : > { %1197 = vmatprep.subr.mxu0 %v1259_v2 }
  0x67   : > { %1198 = vmatpush3.msra.mxu0 %v896_v12 }
  0x68   : > { %1199 = vmatprep.subr.mxu0 %v1259_v2 }
  0x69   : > { %1200 = vmatpush3.msra.mxu0 %v895_v15 }
  0x6a   : > { %1201 = vmatprep.subr.mxu0 %v1259_v2 }
  0x6b   : > { %1202 = vmatpush3.msra.mxu0 %v894_v17 }
  0xec   : > { %v347_v22 = vpop.f32.mrf.mxu0 }
  0xed   : > { %v351_v30 = vmul.f32 %v1647_v29, %v347_v22 }
  0xee   : > { %v1065_v23 = vpop.f32.mrf.mxu0 }
  0xef   : > { %v418_v24 = vpop.f32.mrf.mxu1 }
  0xf0   : > { %v419_v33 = vadd.f32 %v418_v24, %v351_v30 }
  0xf1   : > { %v1100_v25 = vpop.f32.mrf.mxu1 }
 0x10c   : > { %v506_v32 = vpop.f32.mrf.mxu0 }
 0x10d   : > { %v510_v34 = vmul.f32 %v1651_v31, %v506_v32 }
 0x10e   : > { %v1135_v36 = vpop.f32.mrf.mxu0 }
 0x10f   : > { %v511_v37 = vadd.f32 %v510_v34, %v419_v33 }
 0x111   : > { %v519_v38 = vadd.f32 %v893_v35, %v511_v37 }
 0x113   : > { %v520_v39 = vmax.f32 %v519_v38, 0.0 }
 0x115   : > { %521 = vst [vmem:[#allocation3 + $0x8] sm:$0xff] %v520_v39  ;;  %1204 = vmatmul.mubr.f32.vlgmr.msra.gmra.mxu0 %v520_v39 }
 0x11c   : > { %v540_v41 = vld [vmem:[#allocation3 + $0x7] sm:$0xff] }
 0x11d   : > { %1169 = vmatmul.mubr.f32.vlgmr.msra.gmra.mxu1 %v540_v41  ;;  %v698_v57 = vld [vmem:[#allocation3 + $0x9] sm:$0xff] }
 0x11e   : > { %1207 = vmatpush3.msra.mxu1 %v925_v40  ;;  %1238 = vmatprep.mubr.msk.f32.mxu1 %vm1260_vm0, %v1259_v2 }
 0x11f   : > { %1208 = vmatprep.subr.mxu1 %v1259_v2 }
 0x120   : > { %1209 = vmatpush3.msra.mxu1 %v924_v42 }
 0x121   : > { %1210 = vmatprep.subr.mxu1 %v1259_v2 }
 0x122   : > { %1211 = vmatpush3.msra.mxu1 %v923_v43 }
 0x123   : > { %1212 = vmatprep.subr.mxu1 %v1259_v2 }
 0x124   : > { %1213 = vmatpush3.msra.mxu1 %v922_v44 }
 0x125   : > { %1214 = vmatprep.subr.mxu1 %v1259_v2 }
 0x126   : > { %1215 = vmatpush3.msra.mxu1 %v921_v45 }
 0x127   : > { %1216 = vmatprep.subr.mxu1 %v1259_v2 }
 0x128   : > { %1217 = vmatpush3.msra.mxu1 %v920_v46 }
 0x129   : > { %1218 = vmatprep.subr.mxu1 %v1259_v2 }
 0x12a   : > { %1219 = vmatpush3.msra.mxu1 %v919_v47 }
 0x12b   : > { %1220 = vmatprep.subr.mxu1 %v1259_v2 }
 0x12c   : > { %1221 = vmatpush3.msra.mxu1 %v918_v48 }
 0x12d   : > { %1222 = vmatprep.subr.mxu1 %v1259_v2 }
 0x12e   : > { %1223 = vmatpush3.msra.mxu1 %v917_v49 }
 0x12f   : > { %1224 = vmatprep.subr.mxu1 %v1259_v2 }
 0x130   : > { %1225 = vmatpush3.msra.mxu1 %v916_v50 }
 0x131   : > { %1226 = vmatprep.subr.mxu1 %v1259_v2 }
 0x132   : > { %1227 = vmatpush3.msra.mxu1 %v915_v51 }
 0x133   : > { %1228 = vmatprep.subr.mxu1 %v1259_v2 }
 0x134   : > { %1229 = vmatpush3.msra.mxu1 %v914_v52 }
 0x135   : > { %1230 = vmatprep.subr.mxu1 %v1259_v2 }
 0x136   : > { %1231 = vmatpush3.msra.mxu1 %v913_v53 }
 0x137   : > { %1232 = vmatprep.subr.mxu1 %v1259_v2 }
 0x138   : > { %1233 = vmatpush3.msra.mxu1 %v912_v54 }
 0x139   : > { %1234 = vmatprep.subr.mxu1 %v1259_v2 }
 0x13a   : > { %1235 = vmatpush3.msra.mxu1 %v911_v55 }
 0x13b   : > { %1236 = vmatprep.subr.mxu1 %v1259_v2 }
 0x13c   : > { %1237 = vmatpush3.msra.mxu1 %v910_v56 }
 0x13d   : > { %1239 = vmatmul.mubr.f32.vlgmr.msra.gmra.mxu1 %v698_v57 }
 0x1d5   : > { %v694_v58 = vpop.f32.mrf.mxu0 }
 0x1d7   : > { %v1205_v59 = vpop.f32.mrf.mxu0 }
 0x1dd   : > { %v623_v60 = vpop.f32.mrf.mxu1 }
 0x1de   : > { %v627_v62 = vmul.f32 %v1647_v29, %v623_v60 }
 0x1df   : > { %v1170_v61 = vpop.f32.mrf.mxu1 }
 0x1e0   : > { %v695_v0 = vadd.f32 %v694_v58, %v627_v62 }
 0x1fd   : > { %v782_v63 = vpop.f32.mrf.mxu1 }
 0x1fe   : > { %v786_v1 = vmul.f32 %v1651_v31, %v782_v63 }
 0x1ff   : > { %v1240_v4 = vpop.f32.mrf.mxu1 }
 0x200   : > { %v787_v2 = vadd.f32 %v786_v1, %v695_v0 }
 0x202   : > { %v795_v5 = vadd.f32 %v926_v3, %v787_v2 }
 0x204   : > { %v796_v6 = vadd.f32 %v795_v5, %v1357_v13 }
 0x206   : > { %v797_v7 = vmax.f32 %v796_v6, 0.0 }
 0x208   : > { %798 = vst [vmem:[%s219_s23] sm:$0xff] %v797_v7 }
 0x209 PF: > { %s15_s18 = sadd.s32 1, %s1257_s18  }
 0x20a   : > { %p12_p4 = scmp.ge.s32.totalorder %s15_s18, 4  }
 0x20c   :  { %14 = sbr.rel (!%p12_p4) target bundleno = 1 (0x1), region = 74 }

</bundles_post_ra>
